<compile_context>
chip_gen: v7x
topology: tpu7x:2x2x1
jax: 0.10.0
libtpu: 0.0.40
codegen_flags: <defaults>
</compile_context>

<pallas_src>
import jax
import jax.numpy as jnp
from jax.experimental import pallas as pl
from jax.experimental.pallas import tpu as pltpu


# Lane-tile width for the batch axis (multiple of 128).  Two double-buffered
# (in_f, TB) f32 input tiles plus two (1, TB) output tiles are ~7.3 MiB,
# which fits under every generation's scoped-VMEM default (16 MiB v5e,
# 32 MiB v6e/v7x) and well under v7x's 64 MiB physical VMEM.
_DEFAULT_MAX_LANES = 128 * 1024


def _linear_sigmoid_kernel(wb_ref, xt_ref, o_ref):
    """One lane-dense batch tile: o[0, :] = sigmoid(b + sum_k w[k] * x[k, :]).

    wb_ref: (in_f + 1,) f32 scalars in SMEM -- weight row followed by bias.
    xt_ref: (in_f, TB) activations in the caller's native dtype (VMEM).
    o_ref:  (1, TB) lane-dense output tile (VMEM).
    """
    in_f = xt_ref.shape[0]
    # In-kernel upcast: free on the VPU under the memory roofline; the caller
    # never materializes an f32 copy of x in HBM.
    x = xt_ref[...].astype(jnp.float32)                        # (in_f, TB)

    # out_features == 1: no MXU.  Broadcast SMEM-scalar mul+adds keep the work
    # on the VPU, avoid a VMEM weight DMA and the cross-lane XLU reduce, and
    # the (1, TB) result is already lane-dense -> unmasked store.
    z = jnp.full((1, x.shape[1]), wb_ref[in_f], dtype=jnp.float32)   # bias
    for k in range(in_f):                                      # in_f == 6: static unroll
        z = z + wb_ref[k] * x[k:k + 1, :]

    # jax.nn.sigmoid keeps full precision; its exp rides the EUP slot.
    # (pl.reciprocal(..., approx=True) would be free filler but loses bits.)
    o_ref[...] = jax.nn.sigmoid(z).astype(o_ref.dtype)


def binary_classifier_forward(x, weight, bias, *, max_lanes=_DEFAULT_MAX_LANES):
    """sigmoid(x @ weight.T + bias) for nn.Linear(6, 1), one Pallas call.

    Batch is mapped to lanes (x presented as (in_f, batch), output (1, batch)),
    tiled over a 1-D "parallel" grid so large batches double-buffer the
    HBM->VMEM DMA and shard across v7x's two TensorCores.  weight and bias are
    scalar-prefetched into SMEM.  x stays in its native dtype.
    """
    batch, in_f = x.shape
    out_f, in_f_w = weight.shape
    assert in_f == in_f_w and out_f == 1

    # weight row + bias -> (in_f + 1,) f32 scalars for SMEM (7 floats; trivial).
    wb = jnp.concatenate(
        [weight.reshape(-1), bias.reshape(-1)]).astype(jnp.float32)

    # Layout plumbing only: present a lane-dense slab (in_f, batch).
    x_t = x.T

    if batch <= max_lanes:
        tb = batch            # single full-array block (exempt from (8,128))
    else:
        tb = max_lanes        # multiple of 128; ragged last tile handled by Pallas

    grid = (pl.cdiv(batch, tb),)

    out = pl.pallas_call(
        _linear_sigmoid_kernel,
        out_shape=jax.ShapeDtypeStruct((1, batch), x.dtype),
        grid_spec=pltpu.PrefetchScalarGridSpec(
            num_scalar_prefetch=1,                               # wb -> SMEM
            grid=grid,
            in_specs=[pl.BlockSpec((in_f, tb), lambda i, wb_sref: (0, i))],
            out_specs=pl.BlockSpec((1, tb), lambda i, wb_sref: (0, i)),
        ),
        compiler_params=pltpu.CompilerParams(
            # Batch tiles are independent -> megacore-shard on v7x (free
            # elsewhere: v5e/v6e have one TensorCore).
            dimension_semantics=("parallel",),
            # Explicit, generation-portable ceiling (actual usage ~7 MiB):
            # fits v5e's 16 MiB scoped default and v7x's 64 MiB physical VMEM.
            vmem_limit_bytes=16 * 1024 * 1024,
        ),
    )(wb, x_t)

    return out.reshape(batch, out_f)


if __name__ == "__main__":
    key = jax.random.PRNGKey(0)
    k_x, k_w, k_b, k_x2 = jax.random.split(key, 4)

    in_features, out_features = 6, 1

    # Deterministic parameter init mirroring nn.Linear's default:
    # uniform(-1/sqrt(in_features), 1/sqrt(in_features))
    bound = 1.0 / jnp.sqrt(jnp.float32(in_features))
    weight = jax.random.uniform(
        k_w, (out_features, in_features), jnp.float32, -bound, bound)
    bias = jax.random.uniform(
        k_b, (out_features,), jnp.float32, -bound, bound)

    def reference(x):
        return jax.nn.sigmoid(x @ weight.T + bias)

    # Small-shape case matching the module's intended use (batch=2).
    batch = 2
    x = jax.random.normal(k_x, (batch, in_features), jnp.float32)
    y = binary_classifier_forward(x, weight, bias)
    jax.block_until_ready(y)
    assert y.shape == (batch, out_features)
    assert jnp.allclose(y, reference(x), atol=1e-5, rtol=1e-5)

    # Exercise the gridded, lane-dense path (multiple tiles + ragged edge).
    batch2 = 300
    x2 = jax.random.normal(k_x2, (batch2, in_features), jnp.float32)
    y2 = binary_classifier_forward(x2, weight, bias, max_lanes=128)
    jax.block_until_ready(y2)
    assert y2.shape == (batch2, out_features)
    assert jnp.allclose(y2, reference(x2), atol=1e-5, rtol=1e-5)

    print("KERNEL_OK")
</pallas_src>

<mosaic_0001>
module attributes {stable_mosaic.version = 11 : i64} {
  func.func @_linear_sigmoid_kernel(%arg0: i32, %arg1: memref<7xf32, #tpu.memory_space<smem>>, %arg2: memref<6x2xf32, #tpu.memory_space<vmem>>, %arg3: memref<1x2xf32, #tpu.memory_space<vmem>>) attributes {dimension_semantics = [#tpu.dimension_semantics<parallel>], iteration_bounds = array<i64: 1>, scalar_prefetch = 1 : i64, scratch_operands = 0 : i64, tpu.core_type = #tpu.core_type<tc>, window_params = [{transform_indices = @transform_0, window_bounds = array<i64: 6, 2>}, {transform_indices = @transform_1, window_bounds = array<i64: 1, 2>}]} {
    %c0 = arith.constant 0 : index
    %c0_0 = arith.constant 0 : index
    %0 = vector.load %arg2[%c0, %c0_0] : memref<6x2xf32, #tpu.memory_space<vmem>>, vector<6x2xf32>
    %c6 = arith.constant 6 : index
    %1 = memref.load %arg1[%c6] : memref<7xf32, #tpu.memory_space<smem>>
    %2 = vector.broadcast %1 : f32 to vector<1x2xf32>
    %c0_1 = arith.constant 0 : index
    %3 = memref.load %arg1[%c0_1] : memref<7xf32, #tpu.memory_space<smem>>
    %4 = vector.extract_strided_slice %0 {offsets = [0, 0], sizes = [1, 2], strides = [1, 1]} : vector<6x2xf32> to vector<1x2xf32>
    %5 = vector.broadcast %3 : f32 to vector<1x2xf32>
    %6 = arith.mulf %5, %4 : vector<1x2xf32>
    %7 = arith.addf %2, %6 : vector<1x2xf32>
    %c1 = arith.constant 1 : index
    %8 = memref.load %arg1[%c1] : memref<7xf32, #tpu.memory_space<smem>>
    %9 = vector.extract_strided_slice %0 {offsets = [1, 0], sizes = [1, 2], strides = [1, 1]} : vector<6x2xf32> to vector<1x2xf32>
    %10 = vector.broadcast %8 : f32 to vector<1x2xf32>
    %11 = arith.mulf %10, %9 : vector<1x2xf32>
    %12 = arith.addf %7, %11 : vector<1x2xf32>
    %c2 = arith.constant 2 : index
    %13 = memref.load %arg1[%c2] : memref<7xf32, #tpu.memory_space<smem>>
    %14 = vector.extract_strided_slice %0 {offsets = [2, 0], sizes = [1, 2], strides = [1, 1]} : vector<6x2xf32> to vector<1x2xf32>
    %15 = vector.broadcast %13 : f32 to vector<1x2xf32>
    %16 = arith.mulf %15, %14 : vector<1x2xf32>
    %17 = arith.addf %12, %16 : vector<1x2xf32>
    %c3 = arith.constant 3 : index
    %18 = memref.load %arg1[%c3] : memref<7xf32, #tpu.memory_space<smem>>
    %19 = vector.extract_strided_slice %0 {offsets = [3, 0], sizes = [1, 2], strides = [1, 1]} : vector<6x2xf32> to vector<1x2xf32>
    %20 = vector.broadcast %18 : f32 to vector<1x2xf32>
    %21 = arith.mulf %20, %19 : vector<1x2xf32>
    %22 = arith.addf %17, %21 : vector<1x2xf32>
    %c4 = arith.constant 4 : index
    %23 = memref.load %arg1[%c4] : memref<7xf32, #tpu.memory_space<smem>>
    %24 = vector.extract_strided_slice %0 {offsets = [4, 0], sizes = [1, 2], strides = [1, 1]} : vector<6x2xf32> to vector<1x2xf32>
    %25 = vector.broadcast %23 : f32 to vector<1x2xf32>
    %26 = arith.mulf %25, %24 : vector<1x2xf32>
    %27 = arith.addf %22, %26 : vector<1x2xf32>
    %c5 = arith.constant 5 : index
    %28 = memref.load %arg1[%c5] : memref<7xf32, #tpu.memory_space<smem>>
    %29 = vector.extract_strided_slice %0 {offsets = [5, 0], sizes = [1, 2], strides = [1, 1]} : vector<6x2xf32> to vector<1x2xf32>
    %30 = vector.broadcast %28 : f32 to vector<1x2xf32>
    %31 = arith.mulf %30, %29 : vector<1x2xf32>
    %32 = arith.addf %27, %31 : vector<1x2xf32>
    %33 = arith.negf %32 : vector<1x2xf32>
    %34 = math.exp %33 : vector<1x2xf32>
    %cst = arith.constant 1.000000e+00 : f32
    %35 = vector.broadcast %cst : f32 to vector<1x2xf32>
    %36 = arith.addf %35, %34 : vector<1x2xf32>
    %37 = arith.divf %35, %36 : vector<1x2xf32>
    %c0_2 = arith.constant 0 : index
    %c0_3 = arith.constant 0 : index
    %38 = vector.load %arg3[%c0_2, %c0_3] : memref<1x2xf32, #tpu.memory_space<vmem>>, vector<1x2xf32>
    tpu.vector_store %arg3[%c0_2, %c0_3], %37 {strides = array<i32>} : memref<1x2xf32, #tpu.memory_space<vmem>>, vector<1x2xf32>,
    return
  }
  func.func @transform_0(%arg0: i32, %arg1: memref<7xf32, #tpu.memory_space<smem>>) -> (i32, i32) {
    %c0_i32 = arith.constant 0 : i32
    %c0_i32_0 = arith.constant 0 : i32
    return %c0_i32, %arg0 : i32, i32
  }
  func.func @transform_1(%arg0: i32, %arg1: memref<7xf32, #tpu.memory_space<smem>>) -> (i32, i32) {
    %c0_i32 = arith.constant 0 : i32
    %c0_i32_0 = arith.constant 0 : i32
    return %c0_i32, %arg0 : i32, i32
  }
}

</mosaic_0001>

<bundles_post_ra>
// kernel: tpu_custom_call.1
= control target key start
LH: loop header
LB: loop body
LE: loop exit
PB: predicated region body
PF: predicated region fallthrough
CT: control target
= control target key end

     0   :  { %s166_s0 = inlined_call_operand.vmem [shape: f32[7], index: 0, kind: input, shape index: {}]   ;;  %s167_s1 = inlined_call_operand.vmem [shape: f32[6,2], index: 1, kind: input, shape index: {}]   ;;  %s168_s2 = inlined_call_operand.hbm [shape: f32[1,2], index: 2, kind: output, shape index: {}]  }
   0x1   :  { %s7_s11 = sshll.u32 %s166_s0, 4  ;;  %s8_s11 = int_to_ptr.vmem [resolvable:$true] %s7_s11 }
   0x2   :  { %s93_s12 = scalar_lea.vmem %s8_s11, 16  ;;  %p98_p1 = scmp.lt.s32.totalorder %s8_s11, %s8_s11 }
   0x3   :  { %p94_p0 = scmp.ne.s32.totalorder %s8_s11, %s93_s12  ;;  %p99_p2 = scmp.lt.s32.totalorder %s93_s12, %s93_s12 }
   0x5   :  { %p100_p3 = por %p99_p2, %p98_p1 }
   0x7   :  { %p101_p4 = pnand %p100_p3, %p94_p0 }
   0x9   :  { %104 = shalt.err (!%p101_p4)  }
   0xa   :  { %s131_s13 = smov [#allocation3]  }
   0xb   :  { %10 = dma.vmem_to_smem %s8_s11, 16, %s131_s13, [#allocation2] }
   0xc   :  { %127 = dma.done.wait [#allocation2], 16 }
   0xd   :  { %128 = vsyncadd [#allocation2], 4294967280 }
   0xe   :  { %12 = sfence }
   0xf   :  { %s80_s14 = sld [smem:[#allocation3 + $0x6]]  ;;  %s19_s15 = sld [smem:[#allocation3]] }
  0x10   :  { %s81_s16 = sld [smem:[#allocation3 + $0x1]]  ;;  %s82_s17 = sld [smem:[#allocation3 + $0x2]] }
  0x11   :  { %s83_s18 = sld [smem:[#allocation3 + $0x3]]  ;;  %s84_s19 = sld [smem:[#allocation3 + $0x4]] }
  0x12   :  { %13 = vsyncpa [#allocation5], 0  ;;  %s85_s0 = sld [smem:[#allocation3 + $0x5]]  ;;  %v16_v0 = vld [vmem:[%s167_s1] sm:$0x3f]  ;;  %s132_s1 = smov [#allocation4]  }
  0x13   :  { %s72_s22 = sshll.u32 %s132_s1, 4  ;;  %vm64_vm0 = vcmask 8192   ;;  %s73_s22 = int_to_ptr.vmem [resolvable:$true] %s72_s22 }
  0x14   :  { %s105_s23 = scalar_lea.vmem %s73_s22, 16  ;;  %s109_s24 = scalar_lea.vmem %s73_s22, 32 }
  0x15   :  { %v18_v1 = vstv %s80_s14  ;;  %v20_v2 = vstv %s19_s15  ;;  %p106_p5 = scmp.ne.s32.totalorder %s73_s22, %s105_s23  ;;  %p110_p6 = scmp.lt.s32.totalorder %s73_s22, %s73_s22 }
  0x16   :  { %v21_v3 = vmul.f32 %v20_v2, %v16_v0  ;;  %v24_v4 = vstv %s81_s16  ;;  %v31_v5 = vstv %s82_s17  ;;  %p111_p7 = scmp.lt.s32.totalorder %s109_s24, %s105_s23 }
  0x17   :  { %v25_v6 = vmul.f32 %v24_v4, %v16_v0  ;;  %v32_v7 = vmul.f32 %v31_v5, %v16_v0  ;;  %v38_v8 = vstv %s83_s18  ;;  %v45_v9 = vstv %s84_s19 }
  0x18   :  { %v22_v10 = vadd.f32 %v21_v3, %v18_v1  ;;  %v39_v11 = vmul.f32 %v38_v8, %v16_v0  ;;  %v52_v12 = vstv %s85_s0  ;;  %v46_v15 = vmul.f32 %v45_v9, %v16_v0  ;;  %p112_p8 = por %p111_p7, %p110_p6 }
  0x19   :  { %v27_v13 = vrot.slane %v25_v6, 1  ;;  %v34_v14 = vrot.slane %v32_v7, 2  ;;  %v53_v18 = vmul.f32 %v52_v12, %v16_v0 }
  0x1a   :  { %v41_v17 = vrot.slane %v39_v11, 3  ;;  %v48_v20 = vrot.slane %v46_v15, 4  ;;  %p113_p9 = pnand %p112_p8, %p106_p5 }
  0x1b   :  { %v29_v16 = vadd.f32 %v27_v13, %v22_v10  ;;  %v55_v22 = vrot.slane %v53_v18, 5 }
  0x1d   :  { %v36_v19 = vadd.f32 %v34_v14, %v29_v16 }
  0x1f   :  { %v43_v21 = vadd.f32 %v41_v17, %v36_v19 }
  0x21   :  { %v50_v23 = vadd.f32 %v48_v20, %v43_v21 }
  0x23   :  { %v57_v24 = vadd.f32 %v55_v22, %v50_v23 }
  0x25   :  { %v86_v25 = vmul.f32 -1.442695, %v57_v24 }
  0x27   :  { %89 = vpow2.f32 %v86_v25 }
  0x31   :  { %v90_v26 = vpop.eup %89 }
  0x32   :  { %v61_v27 = vadd.f32 1.0, %v90_v26 }
  0x34   :  { %91 = vrcp.f32 %v61_v27 }
  0x3e   :  { %v92_v28 = vpop.eup %91 }
  0x3f   :  { %65 = vst.msk [vmem:[#allocation4] sm:$0x1] %vm64_vm0, %v92_v28 }
  0x40   :  { %116 = shalt.err (!%p113_p9)
}
  0x41   :  { %s117_s27 = scalar_lea.hbm %s168_s2, 16 }
  0x42   :  { %p118_p10 = scmp.ne.s32.totalorder %s168_s2, %s117_s27  ;;  %p121_p11 = scmp.lt.u32.totalorder %s117_s27, %s168_s2 }
  0x44   :  { %p123_p12 = pnand %p121_p11, %p118_p10 }
  0x46   :  { %126 = shalt.err (!%p123_p12)
}
  0x47   :  { %75 = dma.vmem_to_hbm [thread:$0]  %s73_s22, 16, %s168_s2, [#allocation5]  }
  0x48   :  { %129 = dma.done.wait [#allocation5], 16  }
  0x49   :  { %130 = vsyncadd [#allocation5], 4294967280 }
  0x4a   :  { %79 = vsyncpa [#allocation5], 1 }

</bundles_post_ra>
